<compile_context>
chip_gen: v7x
topology: tpu7x:2x2x1
jax: 0.10.0
libtpu: 0.0.40
codegen_flags: <defaults>
</compile_context>

<pallas_src>
import jax
import jax.numpy as jnp
from jax.experimental import pallas as pl
from jax.experimental.pallas import tpu as pltpu


def _prednet_kernel(ex_ref, st_ref, kr_ref, rhs_ref, c0_ref, out_ref):
    # bf16-streamed inputs, upcast once; all math below is f32.
    ex = ex_ref[...].astype(jnp.float32)        # (TB, K) exercise embedding rows
    st = st_ref[...].astype(jnp.float32)        # (TB, K) student embedding rows
    kr = kr_ref[...].astype(jnp.float32)        # (TB, K) 0/1 knowledge-relevance mask

    k = ex.shape[-1]
    # Both terms of the expanded product go through the MXU (it has huge slack
    # at K~32); rhs_ref packs [(w*kn)^T ; tile(w^T, (1,K))] as a (2K, K) block.
    logits = jnp.dot(ex + st, rhs_ref[pl.ds(0, k), :],
                     preferred_element_type=jnp.float32)
    logits += jnp.dot(ex * st, rhs_ref[pl.ds(k, k), :],
                      preferred_element_type=jnp.float32)
    logits += c0_ref[...]                       # (1, K) broadcast: w*kn^2 sum + bias
    o = jax.nn.sigmoid(logits)                  # (TB, K)

    sum_out = jnp.sum(o * kr, axis=-1, keepdims=True)                   # (TB, 1)
    # Floor at 1.0 guards all-zero kn_r rows (reference would NaN/Inf there).
    count = jnp.maximum(jnp.sum(kr, axis=-1, keepdims=True), 1.0)       # (TB, 1)
    out_ref[...] = sum_out / count              # exact divide; only TB scalars


def _pick_tile(batch, k, itemsize=2):
    """VMEM-aware batch tile for the 3 double-buffered bf16 input streams."""
    budget = 12 << 20                       # fits the 16 MiB v5e scoped default
    cap = max(8, budget // (3 * 2 * k * itemsize))
    cap = min(cap, 4096, batch)             # 4096-row ceiling keeps steps sane
    t = cap - cap % 8
    while t >= 8 and batch % t != 0:
        t -= 8
    if t < 8:
        return batch                        # tiny / awkward batch: one full block
    # v7x megacore: for large batches make sure the "parallel" axis has >=2
    # steps so both TensorCores get work (near-free on single-TC v5e/v6e).
    if t == batch and batch >= 256 and (batch // 2) % 8 == 0:
        t = batch // 2
    return t


def prednet_forward(exer_e, stu_e, kn_emb2, kn_r, w, b):
    B, K = exer_e.shape
    tb = _pick_tile(B, K)

    # Batch-invariant precomputation (hoisted out of the grid loop), f32.
    w = w.reshape(1, K)
    wkn_t = (w * kn_emb2).T                                   # (K_j, K_i)
    w_cols = jnp.tile(w.T, (1, K))                            # (K_j, K_i), col i = w
    rhs = jnp.concatenate([wkn_t, w_cols], axis=0)            # (2K, K) resident
    c0 = (jnp.sum(w * kn_emb2 * kn_emb2, axis=-1) + b)[None, :]   # (1, K) resident

    # Stream batch inputs as bf16 (kn_r is a 0/1 mask -> exact), compute in f32.
    exer_b = exer_e.astype(jnp.bfloat16)
    stu_b = stu_e.astype(jnp.bfloat16)
    knr_b = kn_r.astype(jnp.bfloat16)

    out = pl.pallas_call(
        _prednet_kernel,
        out_shape=jax.ShapeDtypeStruct((B, 1), jnp.float32),
        grid_spec=pltpu.PrefetchScalarGridSpec(
            num_scalar_prefetch=0,
            grid=(B // tb,),
            in_specs=[
                pl.BlockSpec((tb, K), lambda i: (i, 0)),       # exercise emb rows (bf16)
                pl.BlockSpec((tb, K), lambda i: (i, 0)),       # student emb rows (bf16)
                pl.BlockSpec((tb, K), lambda i: (i, 0)),       # kn_r mask rows (bf16)
                pl.BlockSpec((2 * K, K), lambda i: (0, 0)),    # packed RHS, resident
                pl.BlockSpec((1, K), lambda i: (0, 0)),        # c0 + bias, resident
            ],
            out_specs=pl.BlockSpec((tb, 1), lambda i: (i, 0)), # (B, 1) column blocks
        ),
        compiler_params=pltpu.CompilerParams(
            dimension_semantics=("parallel",)),
    )(exer_b, stu_b, knr_b, rhs, c0)
    return out


def net_forward(params, stu_id, exer_id, kn_r):
    # Glue (gathers / parameter plumbing) in plain JAX; hot path in Pallas.
    exer_e = params["exer_emb"][exer_id]        # (B, K)  stands in for exer_emb2[exer_id]
    stu_e = params["stu_emb"][stu_id]           # (B, K)  stands in for all_stu_emb2[stu_id]
    return prednet_forward(exer_e, stu_e, params["kn_emb"],
                           kn_r.astype(jnp.float32),
                           params["w3"], params["b3"][0, 0])


def net_forward_ref(params, stu_id, exer_id, kn_r):
    # Straight transcription of the original (3-D broadcast) formulation, f32.
    exer_e = params["exer_emb"][exer_id]
    stu_e = params["stu_emb"][stu_id]
    kn = params["kn_emb"]
    w = params["w3"]
    b = params["b3"][0, 0]
    kr = kn_r.astype(jnp.float32)
    alpha = kn[None, :, :] + exer_e[:, None, :]
    betta = kn[None, :, :] + stu_e[:, None, :]
    logits = jnp.sum(alpha * betta * w[None, :, :], axis=-1) + b
    o = jax.nn.sigmoid(logits)
    sum_out = jnp.sum(o * kr, axis=-1, keepdims=True)
    count = jnp.sum(kr, axis=-1, keepdims=True)
    return sum_out / count


def _xavier_normal(key, shape):
    fan_out, fan_in = shape[0], shape[1]
    std = (2.0 / (fan_in + fan_out)) ** 0.5
    return std * jax.random.normal(key, shape, dtype=jnp.float32)


def _run_case(params, key, batch, student_n, exer_n, knowledge_n):
    k_sid, k_eid, k_knr = jax.random.split(key, 3)
    stu_id = jax.random.randint(k_sid, (batch,), 0, student_n)
    exer_id = jax.random.randint(k_eid, (batch,), 0, exer_n)
    kn_r = (jax.random.uniform(k_knr, (batch, knowledge_n)) < 0.5).astype(jnp.float32)
    # Guarantee at least one relevant concept per row (ref divides by the count).
    kn_r = kn_r.at[:, 0].set(1.0)

    out = jax.block_until_ready(net_forward(params, stu_id, exer_id, kn_r))
    ref = net_forward_ref(params, stu_id, exer_id, kn_r)
    assert out.shape == (batch, 1)
    # bf16 input streaming + f32 re-association -> modestly relaxed tolerance
    # (outputs live in (0, 1); observed error is O(1e-4)).
    assert jnp.allclose(out, ref, atol=2e-3, rtol=2e-3)


if __name__ == "__main__":
    # Small, module-consistent sizes.
    student_n, exer_n, knowledge_n = 8, 16, 32

    key = jax.random.PRNGKey(0)
    k_stu, k_exer, k_kn, k_w, k_small, k_big = jax.random.split(key, 6)

    params = {
        "stu_emb": _xavier_normal(k_stu, (student_n, knowledge_n)),
        "exer_emb": _xavier_normal(k_exer, (exer_n, knowledge_n)),
        "kn_emb": _xavier_normal(k_kn, (knowledge_n, knowledge_n)),
        "w3": _xavier_normal(k_w, (1, knowledge_n)),
        "b3": jnp.zeros((1, 1), dtype=jnp.float32),
    }

    # Small single-block case (block == full array dims).
    _run_case(params, k_small, 8, student_n, exer_n, knowledge_n)
    # Larger batch: exercises the VMEM-aware tile and the 2-step parallel grid
    # (tb = 512 -> grid=(2,), both v7x TensorCores busy).
    _run_case(params, k_big, 1024, student_n, exer_n, knowledge_n)

    print("KERNEL_OK")
</pallas_src>

<mosaic_0001>
module attributes {stable_mosaic.version = 11 : i64} {
  func.func @_prednet_kernel(%arg0: i32, %arg1: memref<8x32xbf16, #tpu.memory_space<vmem>>, %arg2: memref<8x32xbf16, #tpu.memory_space<vmem>>, %arg3: memref<8x32xbf16, #tpu.memory_space<vmem>>, %arg4: memref<64x32xf32, #tpu.memory_space<vmem>>, %arg5: memref<1x32xf32, #tpu.memory_space<vmem>>, %arg6: memref<8x1xf32, #tpu.memory_space<vmem>>) attributes {dimension_semantics = [#tpu.dimension_semantics<parallel>], iteration_bounds = array<i64: 1>, scalar_prefetch = 0 : i64, scratch_operands = 0 : i64, tpu.core_type = #tpu.core_type<tc>, window_params = [{transform_indices = @transform_0, window_bounds = array<i64: 8, 32>}, {transform_indices = @transform_1, window_bounds = array<i64: 8, 32>}, {transform_indices = @transform_2, window_bounds = array<i64: 8, 32>}, {pipeline_mode = #tpu.pipeline_mode<synchronous>, transform_indices = @transform_3, window_bounds = array<i64: 64, 32>}, {pipeline_mode = #tpu.pipeline_mode<synchronous>, transform_indices = @transform_4, window_bounds = array<i64: 1, 32>}, {transform_indices = @transform_5, window_bounds = array<i64: 8, 1>}]} {
    %c0 = arith.constant 0 : index
    %c0_0 = arith.constant 0 : index
    %0 = vector.load %arg1[%c0, %c0_0] : memref<8x32xbf16, #tpu.memory_space<vmem>>, vector<8x32xbf16>
    %1 = arith.extf %0 : vector<8x32xbf16> to vector<8x32xf32>
    %c0_1 = arith.constant 0 : index
    %c0_2 = arith.constant 0 : index
    %2 = vector.load %arg2[%c0_1, %c0_2] : memref<8x32xbf16, #tpu.memory_space<vmem>>, vector<8x32xbf16>
    %3 = arith.extf %2 : vector<8x32xbf16> to vector<8x32xf32>
    %c0_3 = arith.constant 0 : index
    %c0_4 = arith.constant 0 : index
    %4 = vector.load %arg3[%c0_3, %c0_4] : memref<8x32xbf16, #tpu.memory_space<vmem>>, vector<8x32xbf16>
    %5 = arith.extf %4 : vector<8x32xbf16> to vector<8x32xf32>
    %6 = arith.addf %1, %3 : vector<8x32xf32>
    %c0_5 = arith.constant 0 : index
    %c0_6 = arith.constant 0 : index
    %7 = vector.load %arg4[%c0_5, %c0_6] : memref<64x32xf32, #tpu.memory_space<vmem>>, vector<32x32xf32>
    %cst = arith.constant dense<0.000000e+00> : vector<8x32xf32>
    %8 = tpu.matmul %6, %7, %cst {dimension_numbers = #tpu.dot_dimension_numbers<[1], [0], [0], [1], [0, 0, 1, 1], [], []>} : vector<8x32xf32>, vector<32x32xf32>, vector<8x32xf32> -> vector<8x32xf32>
    %9 = arith.mulf %1, %3 : vector<8x32xf32>
    %c32 = arith.constant 32 : index
    %c0_7 = arith.constant 0 : index
    %10 = vector.load %arg4[%c32, %c0_7] : memref<64x32xf32, #tpu.memory_space<vmem>>, vector<32x32xf32>
    %cst_8 = arith.constant dense<0.000000e+00> : vector<8x32xf32>
    %11 = tpu.matmul %9, %10, %cst_8 {dimension_numbers = #tpu.dot_dimension_numbers<[1], [0], [0], [1], [0, 0, 1, 1], [], []>} : vector<8x32xf32>, vector<32x32xf32>, vector<8x32xf32> -> vector<8x32xf32>
    %12 = arith.addf %8, %11 : vector<8x32xf32>
    %c0_9 = arith.constant 0 : index
    %c0_10 = arith.constant 0 : index
    %13 = vector.load %arg5[%c0_9, %c0_10] : memref<1x32xf32, #tpu.memory_space<vmem>>, vector<1x32xf32>
    %14 = vector.broadcast %13 : vector<1x32xf32> to vector<8x32xf32>
    %15 = arith.addf %12, %14 : vector<8x32xf32>
    %16 = arith.negf %15 : vector<8x32xf32>
    %17 = math.exp %16 : vector<8x32xf32>
    %cst_11 = arith.constant 1.000000e+00 : f32
    %18 = vector.broadcast %cst_11 : f32 to vector<8x32xf32>
    %19 = arith.addf %18, %17 : vector<8x32xf32>
    %20 = arith.divf %18, %19 : vector<8x32xf32>
    %21 = arith.mulf %20, %5 : vector<8x32xf32>
    %cst_12 = arith.constant dense<0.000000e+00> : vector<8xf32>
    %22 = vector.multi_reduction <add>, %21, %cst_12 [1] : vector<8x32xf32> to vector<8xf32>
    %23 = vector.shape_cast %22 : vector<8xf32> to vector<8x1xf32>
    %cst_13 = arith.constant dense<0.000000e+00> : vector<8xf32>
    %24 = vector.multi_reduction <add>, %5, %cst_13 [1] : vector<8x32xf32> to vector<8xf32>
    %25 = vector.shape_cast %24 : vector<8xf32> to vector<8x1xf32>
    %cst_14 = arith.constant 1.000000e+00 : f32
    %26 = vector.broadcast %cst_14 : f32 to vector<8x1xf32>
    %27 = arith.maximumf %25, %26 : vector<8x1xf32>
    %28 = arith.divf %23, %27 : vector<8x1xf32>
    %c0_15 = arith.constant 0 : index
    %c0_16 = arith.constant 0 : index
    %29 = vector.load %arg6[%c0_15, %c0_16] : memref<8x1xf32, #tpu.memory_space<vmem>>, vector<8x1xf32>
    tpu.vector_store %arg6[%c0_15, %c0_16], %28 {strides = array<i32>} : memref<8x1xf32, #tpu.memory_space<vmem>>, vector<8x1xf32>,
    return
  }
  func.func @transform_0(%arg0: i32) -> (i32, i32) {
    %c0_i32 = arith.constant 0 : i32
    %c0_i32_0 = arith.constant 0 : i32
    return %arg0, %c0_i32 : i32, i32
  }
  func.func @transform_1(%arg0: i32) -> (i32, i32) {
    %c0_i32 = arith.constant 0 : i32
    %c0_i32_0 = arith.constant 0 : i32
    return %arg0, %c0_i32 : i32, i32
  }
  func.func @transform_2(%arg0: i32) -> (i32, i32) {
    %c0_i32 = arith.constant 0 : i32
    %c0_i32_0 = arith.constant 0 : i32
    return %arg0, %c0_i32 : i32, i32
  }
  func.func @transform_3(%arg0: i32) -> (i32, i32) {
    %c0_i32 = arith.constant 0 : i32
    %c0_i32_0 = arith.constant 0 : i32
    %c0_i32_1 = arith.constant 0 : i32
    return %c0_i32, %c0_i32_0 : i32, i32
  }
  func.func @transform_4(%arg0: i32) -> (i32, i32) {
    %c0_i32 = arith.constant 0 : i32
    %c0_i32_0 = arith.constant 0 : i32
    %c0_i32_1 = arith.constant 0 : i32
    return %c0_i32, %c0_i32_0 : i32, i32
  }
  func.func @transform_5(%arg0: i32) -> (i32, i32) {
    %c0_i32 = arith.constant 0 : i32
    %c0_i32_0 = arith.constant 0 : i32
    return %arg0, %c0_i32 : i32, i32
  }
}

</mosaic_0001>

<bundles_post_ra>
// kernel: tpu_custom_call.1
= control target key start
LH: loop header
LB: loop body
LE: loop exit
PB: predicated region body
PF: predicated region fallthrough
CT: control target
= control target key end

     0   :  { %v270_v0 = vmov 0.0|0.0   ;;  %vm271_vm0 = vmmov 0   ;;  %v272_v8 = vmov 0.0   ;;  %vm36_vm1 = vcmask 261120   ;;  %s346_s3 = inlined_call_operand.vmem [shape: f32[64,32], index: 3, kind: input, shape index: {}]   ;;  %s347_s0 = inlined_call_operand.vmem [shape: bf16[8,32], index: 0, kind: input, shape index: {}]   ;;  %s348_s1 = inlined_call_operand.vmem [shape: bf16[8,32], index: 1, kind: input, shape index: {}]   ;;  %s349_s2 = inlined_call_operand.vmem [shape: bf16[8,32], index: 2, kind: input, shape index: {}]   ;;  %s350_s4 = inlined_call_operand.vmem [shape: f32[1,32], index: 4, kind: input, shape index: {}]   ;;  %s351_s5 = inlined_call_operand.vmem [shape: f32[8,1], index: 5, kind: output, shape index: {}]  }
   0x1   :  { %249 = vmatprep.subr.bf16.mxu0 %v270_v0  ;;  %255 = vmatprep.subr.bf16.mxu1 %v270_v0  ;;  %v32_v1 = vld [vmem:[%s346_s3 + $0x20] sm:$0xff]  ;;  %v33_v2 = vld [vmem:[%s346_s3 + $0x28] sm:$0xff]  ;;  %v34_v6 = vld [vmem:[%s346_s3 + $0x30] sm:$0xff]  ;;  %vm207_vm2 = vcmask 7168  }
   0x2   :  { %v27_v3 = vld [vmem:[%s346_s3] sm:$0xff]  ;;  %v250_v4 = vpack.c.bf16 %v33_v2, %v32_v1  ;;  %v28_v5 = vld [vmem:[%s346_s3 + $0x8] sm:$0xff]  ;;  %v35_v7 = vld [vmem:[%s346_s3 + $0x38] sm:$0xff]  ;;  %235 = vmatprep.mubr.msk.f32.mxu0 %vm271_vm0, %v272_v8  ;;  %246 = vmatprep.mubr.msk.f32.mxu1 %vm271_vm0, %v272_v8 }
   0x3   :  { %v256_v9 = vpack.c.bf16 %v28_v5, %v27_v3  ;;  %v29_v10 = vld [vmem:[%s346_s3 + $0x10] sm:$0xff]  ;;  %v30_v11 = vld [vmem:[%s346_s3 + $0x18] sm:$0xff]  ;;  %v20_v12 = vld [vmem:[%s347_s0] sm:$0xf]  ;;  %v253_v13 = vpack.c.bf16 %v35_v7, %v34_v6 }
   0x4   :  { %251 = vmatpush3.bf16.msra.mxu0 %v250_v4  ;;  %v21_v14 = vunpack.c.l.bf16 %v20_v12  ;;  %v22_v15 = vld [vmem:[%s348_s1] sm:$0xf]  ;;  %v259_v16 = vpack.c.bf16 %v30_v11, %v29_v10 }
   0x5   :  { %257 = vmatpush3.bf16.msra.mxu1 %v256_v9  ;;  %252 = vmatprep.subr.bf16.mxu0 %v270_v0  ;;  %v23_v17 = vunpack.c.l.bf16 %v22_v15  ;;  %v24_v20 = vld [vmem:[%s349_s2] sm:$0xf] }
   0x6   :  { %258 = vmatprep.subr.bf16.mxu1 %v270_v0  ;;  %v25_v21 = vunpack.c.l.bf16 %v24_v20  ;;  %v215_v25 = vld [vmem:[%s350_s4] ss:$0 sm:$0xff] }
   0x7   :  { %v31_v18 = vmul.f32 %v23_v17, %v21_v14  ;;  %v26_v19 = vadd.f32 %v23_v17, %v21_v14 }
   0x8   :  { %254 = vmatpush3.bf16.msra.mxu0 %v253_v13  ;;  %v201_v22 = vsel %vm36_vm1, %v25_v21, 0.0 }
   0x9   :  { %260 = vmatpush3.bf16.msra.mxu1 %v259_v16  ;;  %202 = vadd.xlane.f32.xlu0 %v201_v22 }
   0xb   :  { %236 = vmatmul.mubr.msk.f32.vlgmr.msra.gmra.mrb[0].mxu0 %vm36_vm1, %v31_v18 }
   0xc   :  { %247 = vmatmul.mubr.msk.f32.vlgmr.msra.gmra.mrb[0].mxu1 %vm36_vm1, %v26_v19 }
  0x96   :  { %v203_v36 = vpop.xlane.xlu0 %202 }
  0x97   :  { %v204_v37 = vmax.f32 %v203_v36, 1.0 }
  0xde   :  { %v106_v23 = vpop.f32.mrb[0].mxu0 }
  0xdf   :  { %v179_v24 = vpop.f32.mrb[0].mxu1  ;;  %v237_v26 = vpop.f32.mrb[1].mxu0 }
  0xe0   :  { %v180_v27 = vadd.f32 %v179_v24, %v106_v23  ;;  %v248_v28 = vpop.f32.mrb[1].mxu1 }
  0xe2   :  { %v190_v29 = vadd.f32 %v215_v25, %v180_v27 }
  0xe4   :  { %v216_v30 = vmul.f32 -1.442695, %v190_v29 }
  0xe6   :  { %264 = vpow2.f32 %v216_v30 }
  0xf0   :  { %v265_v31 = vpop.eup %264 }
  0xf1   :  { %v194_v32 = vadd.f32 1.0, %v265_v31 }
  0xf3   :  { %266 = vrcp.f32 %v194_v32 }
  0xf4   :  { %268 = vrcp.f32 %v204_v37 }
  0xfd   :  { %v267_v33 = vpop.eup %266 }
  0xfe   :  { %v197_v34 = vmul.f32 %v267_v33, %v25_v21  ;;  %v269_v38 = vpop.eup %268 }
 0x100   :  { %v198_v35 = vsel %vm36_vm1, %v197_v34, 0.0 }
 0x101   :  { %199 = vadd.xlane.f32.xlu0 %v198_v35 }
 0x18e   :  { %v200_v39 = vpop.xlane.xlu0 %199 }
 0x18f   :  { %v206_v40 = vmul.f32 %v269_v38, %v200_v39 }
 0x191   :  { %208 = vst.msk [vmem:[%s351_s5] sm:$0xff] %vm207_vm2, %v206_v40 }

</bundles_post_ra>
